<compile_context>
chip_gen: v6e
topology: v6e:2x2x1
jax: 0.10.0
libtpu: 0.0.40
codegen_flags: <defaults>
</compile_context>

<pallas_src>
import jax
import jax.numpy as jnp
from jax.experimental import pallas as pl
from jax.experimental.pallas import tpu as pltpu


def _weighted_sum_kernel(w_ref, x1_ref, x2_ref, o_ref):
    # w_ref is the scalar-prefetch (2,) f32 array in SMEM: [w1, w2].
    w1 = w_ref[0]
    w2 = w_ref[1]
    x1 = x1_ref[...].astype(jnp.float32)
    x2 = x2_ref[...].astype(jnp.float32)
    o_ref[...] = (x1 * w1 + x2 * w2).astype(o_ref.dtype)


def weighted_sum(x1, x2, w1, w2):
    """out = x1 * w1 + x2 * w2  (elementwise, scalar f32 weights)."""
    assert x1.shape == x2.shape and x1.dtype == x2.dtype
    orig_shape = x1.shape
    total = x1.size
    dtype = x1.dtype
    itemsize = dtype.itemsize
    # Sublane packing minimum per dtype: f32 -> 8, bf16 -> 16, int8/fp8 -> 32.
    sub = max(8, 32 // itemsize)

    # Pick a wide lane-dense width W (multiple of 128) that divides the total
    # element count so no padding (and no full-tensor copy) is needed.
    lanes = None
    for cand in (8192, 4096, 2048, 1024, 512, 256, 128):
        if total % cand == 0:
            lanes = cand
            break

    if lanes is not None:
        rows = total // lanes
        pad = 0
    else:
        # Ragged fallback: pad the flat tensors up to a (sub x 128)-aligned slab.
        lanes = 128
        rows = pl.cdiv(total, lanes)
        rows = pl.cdiv(rows, sub) * sub
        pad = rows * lanes - total

    def to_slab(x):
        flat = x.reshape(-1)
        if pad:
            flat = jnp.pad(flat, (0, pad))
        return flat.reshape(rows, lanes)

    x1_2d = to_slab(x1)
    x2_2d = to_slab(x2)

    # Block sizing: target ~2 MiB per input block, rows a multiple of the
    # dtype sublane pack (or the full row extent for small tensors).
    target_elems = (2 * 1024 * 1024) // itemsize
    max_block_rows = max(sub, ((target_elems // lanes) // sub) * sub)
    block_rows = rows if rows <= max_block_rows else max_block_rows

    grid = (pl.cdiv(rows, block_rows),)

    # Scalar weights stay in f32 (PyTorch keeps the learnable scalars f32).
    w = jnp.stack([jnp.asarray(w1, jnp.float32).reshape(()),
                   jnp.asarray(w2, jnp.float32).reshape(())])

    out_2d = pl.pallas_call(
        _weighted_sum_kernel,
        out_shape=jax.ShapeDtypeStruct((rows, lanes), dtype),
        grid_spec=pltpu.PrefetchScalarGridSpec(
            num_scalar_prefetch=1,
            grid=grid,
            in_specs=[
                pl.BlockSpec((block_rows, lanes), lambda i, w: (i, 0)),
                pl.BlockSpec((block_rows, lanes), lambda i, w: (i, 0)),
            ],
            out_specs=pl.BlockSpec((block_rows, lanes), lambda i, w: (i, 0)),
        ),
        compiler_params=pltpu.CompilerParams(
            dimension_semantics=("parallel",)),
    )(w, x1_2d, x2_2d)

    out_flat = out_2d.reshape(-1)
    if pad:
        out_flat = out_flat[:total]
    return out_flat.reshape(orig_shape)


if __name__ == "__main__":
    key = jax.random.PRNGKey(0)
    k1, k2, k3, k4 = jax.random.split(key, 4)

    # Deterministic parameter values (torch.FloatTensor(1) is uninitialized;
    # we pick fixed values).
    w1 = jnp.float32(0.3)
    w2 = jnp.float32(0.7)

    # Case 1: small NCHW inputs, element count divisible by 128 (no-pad path).
    x1 = jax.random.normal(k1, (2, 4, 16, 16), dtype=jnp.float32)
    x2 = jax.random.normal(k2, (2, 4, 16, 16), dtype=jnp.float32)
    out = jax.block_until_ready(weighted_sum(x1, x2, w1, w2))
    ref = x1 * w1 + x2 * w2
    assert out.shape == ref.shape and out.dtype == ref.dtype
    assert jnp.allclose(out, ref, atol=1e-6, rtol=1e-6)

    # Case 2: ragged element count (exercises the padded fallback path).
    y1 = jax.random.normal(k3, (3, 5, 7, 11), dtype=jnp.float32)
    y2 = jax.random.normal(k4, (3, 5, 7, 11), dtype=jnp.float32)
    out2 = jax.block_until_ready(weighted_sum(y1, y2, w1, w2))
    ref2 = y1 * w1 + y2 * w2
    assert out2.shape == ref2.shape and out2.dtype == ref2.dtype
    assert jnp.allclose(out2, ref2, atol=1e-6, rtol=1e-6)

    print("KERNEL_OK")
</pallas_src>

<mosaic_0001>
module attributes {stable_mosaic.version = 11 : i64} {
  func.func @_weighted_sum_kernel(%arg0: i32, %arg1: memref<2xf32, #tpu.memory_space<smem>>, %arg2: memref<1x2048xf32, #tpu.memory_space<vmem>>, %arg3: memref<1x2048xf32, #tpu.memory_space<vmem>>, %arg4: memref<1x2048xf32, #tpu.memory_space<vmem>>) attributes {dimension_semantics = [#tpu.dimension_semantics<parallel>], iteration_bounds = array<i64: 1>, scalar_prefetch = 1 : i64, scratch_operands = 0 : i64, tpu.core_type = #tpu.core_type<tc>, window_params = [{transform_indices = @transform_0, window_bounds = array<i64: 1, 2048>}, {transform_indices = @transform_1, window_bounds = array<i64: 1, 2048>}, {transform_indices = @transform_2, window_bounds = array<i64: 1, 2048>}]} {
    %c0 = arith.constant 0 : index
    %0 = memref.load %arg1[%c0] : memref<2xf32, #tpu.memory_space<smem>>
    %c1 = arith.constant 1 : index
    %1 = memref.load %arg1[%c1] : memref<2xf32, #tpu.memory_space<smem>>
    %c0_0 = arith.constant 0 : index
    %c0_1 = arith.constant 0 : index
    %2 = vector.load %arg2[%c0_0, %c0_1] : memref<1x2048xf32, #tpu.memory_space<vmem>>, vector<1x2048xf32>
    %c0_2 = arith.constant 0 : index
    %c0_3 = arith.constant 0 : index
    %3 = vector.load %arg3[%c0_2, %c0_3] : memref<1x2048xf32, #tpu.memory_space<vmem>>, vector<1x2048xf32>
    %4 = vector.broadcast %0 : f32 to vector<1x2048xf32>
    %5 = arith.mulf %2, %4 : vector<1x2048xf32>
    %6 = vector.broadcast %1 : f32 to vector<1x2048xf32>
    %7 = arith.mulf %3, %6 : vector<1x2048xf32>
    %8 = arith.addf %5, %7 : vector<1x2048xf32>
    %c0_4 = arith.constant 0 : index
    %c0_5 = arith.constant 0 : index
    %9 = vector.load %arg4[%c0_4, %c0_5] : memref<1x2048xf32, #tpu.memory_space<vmem>>, vector<1x2048xf32>
    tpu.vector_store %arg4[%c0_4, %c0_5], %8 {strides = array<i32>} : memref<1x2048xf32, #tpu.memory_space<vmem>>, vector<1x2048xf32>,
    return
  }
  func.func @transform_0(%arg0: i32, %arg1: memref<2xf32, #tpu.memory_space<smem>>) -> (i32, i32) {
    %c0_i32 = arith.constant 0 : i32
    %c0_i32_0 = arith.constant 0 : i32
    return %arg0, %c0_i32 : i32, i32
  }
  func.func @transform_1(%arg0: i32, %arg1: memref<2xf32, #tpu.memory_space<smem>>) -> (i32, i32) {
    %c0_i32 = arith.constant 0 : i32
    %c0_i32_0 = arith.constant 0 : i32
    return %arg0, %c0_i32 : i32, i32
  }
  func.func @transform_2(%arg0: i32, %arg1: memref<2xf32, #tpu.memory_space<smem>>) -> (i32, i32) {
    %c0_i32 = arith.constant 0 : i32
    %c0_i32_0 = arith.constant 0 : i32
    return %arg0, %c0_i32 : i32, i32
  }
}

</mosaic_0001>

<bundles_post_ra>
// kernel: tpu_custom_call.1
= control target key start
LH: loop header
LB: loop body
LE: loop exit
PB: predicated region body
PF: predicated region fallthrough
CT: control target
= control target key end

     0   :  { %s154_s12 = smov [#allocation3]   ;;  %s190_s0 = inlined_call_operand.hbm [shape: f32[2], index: 0, kind: input, shape index: {}]   ;;  %s191_s1 = inlined_call_operand.hbm [shape: f32[1,2048], index: 1, kind: input, shape index: {}]   ;;  %s192_s2 = inlined_call_operand.hbm [shape: f32[1,2048], index: 2, kind: input, shape index: {}]   ;;  %s193_s3 = inlined_call_operand.hbm [shape: f32[1,2048], index: 3, kind: output, shape index: {}]  }
   0x1   :  { %9 = dma.hbm_to_smem %s190_s0, 16, %s154_s12, [#allocation2] }
   0x2   :  { %146 = dma.done.wait [#allocation2], 16 }
   0x3   :  { %147 = vsyncadd [#allocation2], 4294967280 }
   0x4   :  { %11 = sfence }
   0x5   :  { %12 = vsyncpa [#allocation5], 0 }
   0x6   :  { %13 = vsyncpa [#allocation8], 0 }
   0x7   :  { %14 = vsyncpa [#allocation6], 0  ;;  %s155_s15 = smov [#allocation4]   ;;  %s156_s17 = smov [#allocation7]  }
   0x8   :  { %s21_s16 = sshll.u32 %s155_s15, 4  ;;  %s31_s18 = sshll.u32 %s156_s17, 4  ;;  %s22_s16 = int_to_ptr.vmem [resolvable:$true] %s21_s16  ;;  %s32_s18 = int_to_ptr.vmem [resolvable:$true] %s31_s18 }
   0x9   :  { %s94_s19 = scalar_lea.vmem %s22_s16, 256  ;;  %p99_p1 = scmp.lt.s32.totalorder %s22_s16, %s22_s16 }
   0xa   :  { %p95_p0 = scmp.ne.s32.totalorder %s22_s16, %s94_s19  ;;  %p100_p2 = scmp.lt.s32.totalorder %s94_s19, %s94_s19 }
   0xc   :  { %p101_p3 = por %p100_p2, %p99_p1 }
   0xe   :  { %p102_p4 = pnand %p101_p3, %p95_p0 }
  0x10   :  { %105 = shalt.err (!%p102_p4)
}
  0x11   :  { %24 = dma.hbm_to_vmem [thread:$0]  %s191_s1, 256, %s22_s16, [#allocation5]  }
  0x12   :  { %s114_s21 = scalar_lea.vmem %s32_s18, 256  ;;  %p119_p6 = scmp.lt.s32.totalorder %s32_s18, %s32_s18 }
  0x13   :  { %p115_p5 = scmp.ne.s32.totalorder %s32_s18, %s114_s21  ;;  %p120_p7 = scmp.lt.s32.totalorder %s114_s21, %s114_s21 }
  0x15   :  { %p121_p8 = por %p120_p7, %p119_p6 }
  0x17   :  { %p122_p9 = pnand %p121_p8, %p115_p5 }
  0x19   :  { %125 = shalt.err (!%p122_p9)
}
  0x1a   :  { %34 = dma.hbm_to_vmem [thread:$0]  %s192_s2, 256, %s32_s18, [#allocation8]  }
  0x1b   :  { %148 = dma.done.wait [#allocation5], 256  }
  0x1c   :  { %149 = vsyncadd [#allocation5], 4294967040 }
  0x1d   :  { %150 = dma.done.wait [#allocation8], 256  }
  0x1e   :  { %151 = vsyncadd [#allocation8], 4294967040  ;;  %s41_s24 = sld [smem:[#allocation3]]  ;;  %v43_v0 = vld [vmem:[#allocation4] sm:$0xff]  ;;  %v45_v1 = vld [vmem:[#allocation7] sm:$0xff]  ;;  %s157_s1 = smov [#allocation9]  }
  0x1f   :  { %s73_s25 = sld [smem:[#allocation3 + $0x1]]  ;;  %v44_v3 = vld [vmem:[#allocation4 + $0x8] sm:$0xff]  ;;  %v46_v6 = vld [vmem:[#allocation7 + $0x8] sm:$0xff]  ;;  %s63_s26 = sshll.u32 %s157_s1, 4  ;;  %s64_s26 = int_to_ptr.vmem [resolvable:$true] %s63_s26 }
  0x20   :  { %s126_s2 = scalar_lea.vmem %s64_s26, 256  ;;  %p131_p11 = scmp.lt.s32.totalorder %s64_s26, %s64_s26 }
  0x21   :  { %p127_p10 = scmp.ne.s32.totalorder %s64_s26, %s126_s2  ;;  %p132_p12 = scmp.lt.s32.totalorder %s126_s2, %s126_s2 }
  0x23   :  { %p133_p13 = por %p132_p12, %p131_p11 }
  0x24   :  { %v47_v2 = vstv %s41_s24 }
  0x25   :  { %v48_v4 = vmul.f32 %v47_v2, %v43_v0  ;;  %v50_v5 = vstv %s73_s25  ;;  %v49_v7 = vmul.f32 %v47_v2, %v44_v3  ;;  %p134_p0 = pnand %p133_p13, %p127_p10 }
  0x26   :  { %v51_v8 = vmul.f32 %v50_v5, %v45_v1  ;;  %v52_v9 = vmul.f32 %v50_v5, %v46_v6 }
  0x28   :  { %v53_v10 = vadd.f32 %v51_v8, %v48_v4  ;;  %v54_v11 = vadd.f32 %v52_v9, %v49_v7 }
  0x2a   :  { %55 = vst [vmem:[#allocation9] sm:$0xff] %v53_v10  ;;  %56 = vst [vmem:[#allocation9 + $0x8] sm:$0xff] %v54_v11 }
  0x2b   :  { %137 = shalt.err (!%p134_p0)
}
  0x2c   :  { %66 = dma.vmem_to_hbm [thread:$0]  %s64_s26, 256, %s193_s3, [#allocation6]  }
  0x2d   :  { %152 = dma.done.wait [#allocation6], 256  }
  0x2e   :  { %153 = vsyncadd [#allocation6], 4294967040 }
  0x2f   :  { %70 = vsyncpa [#allocation5], 1 }
  0x30   :  { %71 = vsyncpa [#allocation8], 1 }
  0x31   :  { %72 = vsyncpa [#allocation6], 1 }

</bundles_post_ra>
